<compile_context>
chip_gen: v7x
topology: tpu7x:2x2x1
jax: 0.10.0
libtpu: 0.0.40
codegen_flags: <defaults>
</compile_context>

<pallas_src>
import functools

import jax
import jax.numpy as jnp
from jax.experimental import pallas as pl
from jax.experimental.pallas import tpu as pltpu


def _round_up(n, mult):
    return ((n + mult - 1) // mult) * mult


def _is_v7x():
    try:
        return "v7" in jax.devices()[0].device_kind.lower()
    except Exception:
        return False


def _tpu_vmem_budget_bytes():
    """Generation-aware scoped-VMEM budget (bytes)."""
    if _is_v7x():
        # 64 MiB physical per TensorCore -> leave headroom for compiler scratch.
        return 52 * 1024 * 1024
    # v5e / v6e: 128 MiB physical VMEM.
    return 100 * 1024 * 1024


def ensemble_kernel(x_ref, w_ref, bmean_ref, o_ref, wsum_ref, *,
                    inv_num_models, tile_m):
    """grid = (C_tiles, model_tiles); model axis innermost ('arbitrary')."""
    mi = pl.program_id(1)

    @pl.when(mi == 0)
    def _():
        wsum_ref[...] = jnp.zeros_like(wsum_ref)

    # Fold this block of TM models into the running f32 weight sum.
    # Static unroll: one load + one store of wsum per grid step, no axis-0
    # sum temporary (single VPU pass, keeps the store slot clear on v5e).
    acc = wsum_ref[...]
    for t in range(tile_m):
        acc = acc + w_ref[t].astype(jnp.float32)
    wsum_ref[...] = acc

    # Finalize: one MXU matmul per C tile against the (un-scaled) weight sum;
    # 1/M is applied to the (B, TC) logits in f32, mean-bias added once, then
    # a single lane-dense output store.
    @pl.when(mi == pl.num_programs(1) - 1)
    def _():
        logits = jnp.dot(x_ref[...], wsum_ref[...].astype(x_ref.dtype),
                         preferred_element_type=jnp.float32)
        o_ref[...] = (logits * inv_num_models
                      + bmean_ref[...]).astype(o_ref.dtype)


def prepare_ensemble(W, b, *, tile_m=4, compute_dtype=None):
    """One-time (construction-time) packing of the ensemble parameters.

    Pads C to a multiple of 128 and M to a multiple of tile_m, and folds the
    per-model biases into their mean — all OUTSIDE the per-call hot path, so
    the forward kernel streams W straight from its resting HBM layout with no
    per-call jnp.pad copy.  Padded model slots are zero (contribute nothing
    to the in-kernel sum); padded classes are sliced off after the kernel.
    """
    M, D, C = W.shape
    assert b.shape == (M, C)
    TM = max(1, int(tile_m))
    C_pad = _round_up(C, 128)
    M_pad = _round_up(M, TM)

    if compute_dtype is not None:
        W = W.astype(compute_dtype)
    W_p = jnp.pad(W, ((0, M_pad - M), (0, 0), (0, C_pad - C)))
    b_mean = jnp.pad(jnp.mean(b.astype(jnp.float32), axis=0),
                     (0, C_pad - C)).reshape(1, C_pad)
    return dict(W=W_p, b_mean=b_mean, num_models=M, num_classes=C, tile_m=TM)


def ensembler_forward(x, params, *, tile_c=None):
    """x: [B, D] -> [B, C] = mean_m(x @ W_m + b_m), params from prepare_ensemble."""
    W_p, b_mean = params["W"], params["b_mean"]
    M_true, C = params["num_models"], params["num_classes"]
    TM = params["tile_m"]
    M_pad, D, C_pad = W_p.shape
    B, D_x = x.shape
    assert D_x == D

    # Sublane-dense batch (pad is a no-op when B is already aligned).
    sublane = 16 if x.dtype == jnp.bfloat16 else 8
    B_pad = _round_up(B, sublane)
    x_p = jnp.pad(x, ((0, B_pad - B), (0, 0))) if B_pad != B else x

    budget = _tpu_vmem_budget_bytes()

    def footprint(tc):
        x_bytes = B_pad * D * x_p.dtype.itemsize            # single-buffered x
        w_bytes = 2 * TM * D * tc * W_p.dtype.itemsize       # double-buffered W
        b_bytes = 2 * tc * 4                                 # mean bias tile
        o_bytes = 2 * B_pad * tc * 4                         # output tile
        s_bytes = D * tc * 4                                 # wsum scratch
        return x_bytes + w_bytes + b_bytes + o_bytes + s_bytes

    # Lane-dense C tile: largest of {512, 256, 128} dividing C_pad that fits
    # the budget with headroom; on v7x prefer >= 2 C tiles so both TensorCores
    # get work along the "parallel" axis.
    if tile_c is not None and tile_c % 128 == 0 and C_pad % tile_c == 0:
        TC = tile_c
    else:
        TC = 128
        for cand in (512, 256):
            if C_pad % cand != 0:
                continue
            if _is_v7x() and C_pad // cand < 2:
                continue
            if footprint(cand) <= 0.8 * budget:
                TC = cand
                break
    n_ct = C_pad // TC
    n_mt = M_pad // TM

    vmem_limit = int(min(budget, max(2 * footprint(TC), 32 * 1024 * 1024)))

    kernel = functools.partial(ensemble_kernel,
                               inv_num_models=1.0 / M_true, tile_m=TM)

    # x is grid-invariant -> request a single pipeline buffer for it.
    x_index_map = lambda ci, mi: (0, 0)
    x_spec = pl.BlockSpec((B_pad, D), x_index_map)
    if hasattr(pl, "Buffered"):
        try:
            x_spec = pl.BlockSpec((B_pad, D), x_index_map,
                                  pipeline_mode=pl.Buffered(1))
        except TypeError:
            pass  # older BlockSpec without pipeline_mode

    cost = pl.CostEstimate(
        flops=2 * B_pad * D * C_pad + M_pad * D * C_pad,
        transcendentals=0,
        bytes_accessed=(M_pad * D * C_pad * W_p.dtype.itemsize
                        + B_pad * D * x_p.dtype.itemsize
                        + C_pad * 4
                        + B_pad * C_pad * 4),
    )

    out_p = pl.pallas_call(
        kernel,
        out_shape=jax.ShapeDtypeStruct((B_pad, C_pad), jnp.float32),
        grid_spec=pltpu.PrefetchScalarGridSpec(
            num_scalar_prefetch=0,
            grid=(n_ct, n_mt),
            in_specs=[
                x_spec,                                                  # resident x
                pl.BlockSpec((TM, D, TC), lambda ci, mi: (mi, 0, ci)),   # W tiles
                pl.BlockSpec((1, TC), lambda ci, mi: (0, ci)),           # mean bias
            ],
            out_specs=pl.BlockSpec((B_pad, TC), lambda ci, mi: (0, ci)),
            scratch_shapes=[
                pltpu.VMEM((D, TC), jnp.float32),   # running weight sum
            ],
        ),
        compiler_params=pltpu.CompilerParams(
            # C tiles are independent (megacore sharding on v7x); the model
            # axis is the reduction and stays innermost / "arbitrary".
            dimension_semantics=("parallel", "arbitrary"),
            vmem_limit_bytes=vmem_limit,
        ),
        cost_estimate=cost,
    )(x_p, W_p, b_mean)

    return out_p[:B, :C]


if __name__ == "__main__":
    key = jax.random.PRNGKey(0)
    # Small but deliberately ragged shapes: C pads to 256, M pads to 8.
    B, D, C, M = 8, 32, 200, 5

    kx, kw, kb = jax.random.split(key, 3)
    x = jax.random.normal(kx, (B, D), dtype=jnp.float32)
    # Deterministic per-model parameters (synthetic "checkpoints").
    W = jax.random.normal(kw, (M, D, C), dtype=jnp.float32) * 0.05
    b = jax.random.normal(kb, (M, C), dtype=jnp.float32) * 0.1

    # Pure-JAX reference: stack each model's output, then mean over models.
    ref = jnp.mean(
        jnp.stack([x @ W[m] + b[m] for m in range(M)], axis=0), axis=0
    )

    # f32 path (exact semantics of the PyTorch module).
    params = prepare_ensemble(W, b, tile_m=4)
    out = jax.block_until_ready(ensembler_forward(x, params))
    assert out.shape == (B, C)
    assert jnp.allclose(out, ref, atol=1e-4, rtol=1e-4)

    # bf16 weight/activation path: halves HBM traffic on the dominant weight
    # stream (accumulation stays f32); looser tolerance for bf16 rounding.
    params_bf16 = prepare_ensemble(W, b, tile_m=4, compute_dtype=jnp.bfloat16)
    out_bf16 = jax.block_until_ready(
        ensembler_forward(x.astype(jnp.bfloat16), params_bf16)
    )
    assert out_bf16.shape == (B, C)
    assert jnp.allclose(out_bf16, ref, atol=5e-2, rtol=5e-2)

    print("KERNEL_OK")
</pallas_src>

<mosaic_0001>
module attributes {stable_mosaic.version = 11 : i64} {
  func.func @ensemble_kernel(%arg0: i32, %arg1: i32, %arg2: memref<8x32xf32, #tpu.memory_space<vmem>>, %arg3: memref<4x32x256xf32, #tpu.memory_space<vmem>>, %arg4: memref<1x256xf32, #tpu.memory_space<vmem>>, %arg5: memref<8x256xf32, #tpu.memory_space<vmem>>, %arg6: memref<32x256xf32, #tpu.memory_space<vmem>>) attributes {dimension_semantics = [#tpu.dimension_semantics<parallel>, #tpu.dimension_semantics<arbitrary>], iteration_bounds = array<i64: 1, 2>, scalar_prefetch = 0 : i64, scratch_operands = 1 : i64, tpu.core_type = #tpu.core_type<tc>, window_params = [{pipeline_mode = #tpu.pipeline_mode<synchronous>, transform_indices = @transform_0, window_bounds = array<i64: 8, 32>}, {transform_indices = @transform_1, window_bounds = array<i64: 4, 32, 256>}, {transform_indices = @transform_2, window_bounds = array<i64: 1, 256>}, {transform_indices = @transform_3, window_bounds = array<i64: 8, 256>}]} {
    %c0_i32 = arith.constant 0 : i32
    %0 = arith.cmpi eq, %arg1, %c0_i32 : i32
    %1 = arith.extui %0 : i1 to i32
    %c0_i32_0 = arith.constant 0 : i32
    %2 = arith.cmpi ne, %1, %c0_i32_0 : i32
    scf.if %2 {
      %cst = arith.constant 0.000000e+00 : f32
      %20 = vector.broadcast %cst : f32 to vector<32x256xf32>
      %c0_14 = arith.constant 0 : index
      %c0_15 = arith.constant 0 : index
      %21 = vector.load %arg6[%c0_14, %c0_15] : memref<32x256xf32, #tpu.memory_space<vmem>>, vector<32x256xf32>
      tpu.vector_store %arg6[%c0_14, %c0_15], %20 {strides = array<i32>} : memref<32x256xf32, #tpu.memory_space<vmem>>, vector<32x256xf32>,
    } else {
    }
    %c0 = arith.constant 0 : index
    %c0_1 = arith.constant 0 : index
    %3 = vector.load %arg6[%c0, %c0_1] : memref<32x256xf32, #tpu.memory_space<vmem>>, vector<32x256xf32>
    %c0_2 = arith.constant 0 : index
    %c0_3 = arith.constant 0 : index
    %c0_4 = arith.constant 0 : index
    %4 = vector.load %arg3[%c0_2, %c0_3, %c0_4] : memref<4x32x256xf32, #tpu.memory_space<vmem>>, vector<1x32x256xf32>
    %5 = vector.shape_cast %4 : vector<1x32x256xf32> to vector<32x256xf32>
    %6 = arith.addf %3, %5 : vector<32x256xf32>
    %c1 = arith.constant 1 : index
    %c0_5 = arith.constant 0 : index
    %c0_6 = arith.constant 0 : index
    %7 = vector.load %arg3[%c1, %c0_5, %c0_6] : memref<4x32x256xf32, #tpu.memory_space<vmem>>, vector<1x32x256xf32>
    %8 = vector.shape_cast %7 : vector<1x32x256xf32> to vector<32x256xf32>
    %9 = arith.addf %6, %8 : vector<32x256xf32>
    %c2 = arith.constant 2 : index
    %c0_7 = arith.constant 0 : index
    %c0_8 = arith.constant 0 : index
    %10 = vector.load %arg3[%c2, %c0_7, %c0_8] : memref<4x32x256xf32, #tpu.memory_space<vmem>>, vector<1x32x256xf32>
    %11 = vector.shape_cast %10 : vector<1x32x256xf32> to vector<32x256xf32>
    %12 = arith.addf %9, %11 : vector<32x256xf32>
    %c3 = arith.constant 3 : index
    %c0_9 = arith.constant 0 : index
    %c0_10 = arith.constant 0 : index
    %13 = vector.load %arg3[%c3, %c0_9, %c0_10] : memref<4x32x256xf32, #tpu.memory_space<vmem>>, vector<1x32x256xf32>
    %14 = vector.shape_cast %13 : vector<1x32x256xf32> to vector<32x256xf32>
    %15 = arith.addf %12, %14 : vector<32x256xf32>
    %c0_11 = arith.constant 0 : index
    %c0_12 = arith.constant 0 : index
    %16 = vector.load %arg6[%c0_11, %c0_12] : memref<32x256xf32, #tpu.memory_space<vmem>>, vector<32x256xf32>
    tpu.vector_store %arg6[%c0_11, %c0_12], %15 {strides = array<i32>} : memref<32x256xf32, #tpu.memory_space<vmem>>, vector<32x256xf32>,
    %c1_i32 = arith.constant 1 : i32
    %17 = arith.cmpi eq, %arg1, %c1_i32 : i32
    %18 = arith.extui %17 : i1 to i32
    %c0_i32_13 = arith.constant 0 : i32
    %19 = arith.cmpi ne, %18, %c0_i32_13 : i32
    scf.if %19 {
      %c0_14 = arith.constant 0 : index
      %c0_15 = arith.constant 0 : index
      %20 = vector.load %arg2[%c0_14, %c0_15] : memref<8x32xf32, #tpu.memory_space<vmem>>, vector<8x32xf32>
      %c0_16 = arith.constant 0 : index
      %c0_17 = arith.constant 0 : index
      %21 = vector.load %arg6[%c0_16, %c0_17] : memref<32x256xf32, #tpu.memory_space<vmem>>, vector<32x256xf32>
      %cst = arith.constant dense<0.000000e+00> : vector<8x256xf32>
      %22 = tpu.matmul %20, %21, %cst {dimension_numbers = #tpu.dot_dimension_numbers<[1], [0], [0], [1], [0, 0, 1, 1], [], []>} : vector<8x32xf32>, vector<32x256xf32>, vector<8x256xf32> -> vector<8x256xf32>
      %cst_18 = arith.constant 2.000000e-01 : f32
      %23 = vector.broadcast %cst_18 : f32 to vector<8x256xf32>
      %24 = arith.mulf %22, %23 : vector<8x256xf32>
      %c0_19 = arith.constant 0 : index
      %c0_20 = arith.constant 0 : index
      %25 = vector.load %arg4[%c0_19, %c0_20] : memref<1x256xf32, #tpu.memory_space<vmem>>, vector<1x256xf32>
      %26 = vector.broadcast %25 : vector<1x256xf32> to vector<8x256xf32>
      %27 = arith.addf %24, %26 : vector<8x256xf32>
      %c0_21 = arith.constant 0 : index
      %c0_22 = arith.constant 0 : index
      %28 = vector.load %arg5[%c0_21, %c0_22] : memref<8x256xf32, #tpu.memory_space<vmem>>, vector<8x256xf32>
      tpu.vector_store %arg5[%c0_21, %c0_22], %27 {strides = array<i32>} : memref<8x256xf32, #tpu.memory_space<vmem>>, vector<8x256xf32>,
    } else {
    }
    return
  }
  func.func @transform_0(%arg0: i32, %arg1: i32) -> (i32, i32) {
    %c0_i32 = arith.constant 0 : i32
    %c0_i32_0 = arith.constant 0 : i32
    %c0_i32_1 = arith.constant 0 : i32
    return %c0_i32, %c0_i32_0 : i32, i32
  }
  func.func @transform_1(%arg0: i32, %arg1: i32) -> (i32, i32, i32) {
    %c0_i32 = arith.constant 0 : i32
    %c0_i32_0 = arith.constant 0 : i32
    return %arg1, %c0_i32, %arg0 : i32, i32, i32
  }
  func.func @transform_2(%arg0: i32, %arg1: i32) -> (i32, i32) {
    %c0_i32 = arith.constant 0 : i32
    %c0_i32_0 = arith.constant 0 : i32
    return %c0_i32, %arg0 : i32, i32
  }
  func.func @transform_3(%arg0: i32, %arg1: i32) -> (i32, i32) {
    %c0_i32 = arith.constant 0 : i32
    %c0_i32_0 = arith.constant 0 : i32
    return %c0_i32, %arg0 : i32, i32
  }
}

</mosaic_0001>

<bundles_post_ra>
// kernel: tpu_custom_call.1
= control target key start
LH: loop header
LB: loop body
LE: loop exit
PB: predicated region body
PF: predicated region fallthrough
CT: control target
= control target key end

     0   :  { %8 = vsyncpa [#allocation4], 0  ;;  %s1068_s0 = inlined_call_operand.hbm [shape: f32[8,32], index: 0, kind: input, shape index: {}]   ;;  %s1069_s1 = inlined_call_operand.hbm [shape: f32[8,32,256], index: 1, kind: input, shape index: {}]   ;;  %s1070_s2 = inlined_call_operand.vmem [shape: f32[1,256], index: 2, kind: input, shape index: {}]   ;;  %s1071_s3 = inlined_call_operand.hbm [shape: f32[8,256], index: 3, kind: output, shape index: {}]  }
   0x1   :  { %9 = vsyncpa [#allocation7], 0 }
   0x2   :  { %11 = vsyncpa [#allocation7 + $0x1], 0 }
   0x3   :  { %12 = vsyncpa [#allocation5], 0  ;;  %s834_s12 = smov 0   ;;  %s836_s13 = smov 0  }
   0x4   :  { %s838_s14 = smov 0   ;;  %s840_s15 = smov 0  }
   0x5   :  { %s842_s16 = smov 0   ;;  %s844_s17 = smov 0  }
   0x6 LB: > { %s533_s18 = sadd.s32 4294967295, %s805_s17   ;;  %s60_s19 = sadd.s32 1, %s793_s14  ;;  %s805_s17 = sphi %s844_s17, %s18_s17   ;;  %s801_s16 = sphi %s842_s16, %s1092_s16   ;;  %s797_s15 = sphi %s840_s15, %s1091_s15   ;;  %s793_s14 = sphi %s838_s14, %s1090_s14   ;;  %s789_s13 = sphi %s836_s13, %s1089_s13   ;;  %s785_s12 = sphi %s834_s12, %s1088_s12  }
   0x7   : > { %p67_p0 = scmp.ne.s32.totalorder %s793_s14, %s789_s13  ;;  %p68_p1 = scmp.eq.s32.totalorder %s805_s17, 0 }
   0x8   : > { %p73_p2 = scmp.ne.s32.totalorder %s789_s13, %s785_s12  ;;  %p870_p3 = scmp.eq.s32.totalorder %s533_s18, 0 }
   0x9   : > { %p69_p4 = por %p68_p1, %p67_p0  ;;  %p534_p5 = scmp.ge.s32.totalorder %s805_s17, 1 }
   0xa   : > { %s1077_s20 = scalar_select %p870_p3, 1, 0 }
   0xb   : > { %p877_p6 = por %p870_p3, %p73_p2  ;;  %p136_p7 = scmp.lt.s32.totalorder %s805_s17, 3 }
   0xc   : > { %s807_s23 = smov [#allocation3]   ;;  %p605_p10 = scmp.lt.s32.totalorder %s805_s17, 2 }
   0xd   : > { %s1078_s21 = scalar_select %p877_p6, 1, 0 }
   0xe   : > { %p882_p8 = pnand %p534_p5, %p136_p7  ;;  %s149_s24 = sshll.u32 %s807_s23, 4  ;;  %s150_s24 = int_to_ptr.vmem [resolvable:$true] %s149_s24 }
   0xf   : > { %s168_s25 = sand.u32 1, %s793_s14   ;;  %p896_p12 = pnand %p605_p10, %p69_p4 }
  0x10   : > { %s1079_s22 = scalar_select %p882_p8, 1, 0 }
  0x11   : > { %p596_p9 = pneg %p882_p8  ;;  %s663_s30 = scalar_lea.hbm %s1068_s0, 128 }
  0x12   : > { %s1081_s27 = scalar_select %p896_p12, 1, 0 }
  0x13   : > { %p892_p11 = pnand %p596_p9, %p870_p3  ;;  %p664_p13 = scmp.ne.s32.totalorder %s1068_s0, %s663_s30 }
  0x14   : > { %p670_p5 = scmp.lt.u32.totalorder %s663_s30, %s1068_s0 }
  0x15   : > { %p665_p0 = pneg %p892_p11 }
  0x17   : > { %p666_p1 = pnand %p665_p0, %p664_p13 }
  0x19   : > { %p667_p2 = pneg %p666_p1 }
  0x1b   : > { %p672_p4 = pnand %p670_p5, %p667_p2 }
  0x1d   : > { %675 = shalt.err (!%p672_p4)
}
  0x1e   : > { %s676_s8 = scalar_lea.vmem %s150_s24, 128  ;;  %p684_p6 = scmp.lt.s32.totalorder %s150_s24, %s150_s24 }
  0x1f   : > { %p677_p7 = scmp.ne.s32.totalorder %s150_s24, %s676_s8  ;;  %p685_p3 = scmp.lt.s32.totalorder %s676_s8, %s676_s8 }
  0x21   : > { %p679_p9 = pnand %p677_p7, %p665_p0  ;;  %p686_p8 = por %p685_p3, %p684_p6 }
  0x23   : > { %p680_p10 = pneg %p679_p9 }
  0x25   : > { %p687_p12 = pnand %p686_p8, %p680_p10 }
  0x27   : > { %690 = shalt.err (!%p687_p12)
}
  0x28   : > { %599 = dma.hbm_to_vmem [thread:$0]  (!%p892_p11), %s1068_s0, 128, %s150_s24, [#allocation4]  }
  0x29   : > { %s27_s11 = sadd.s32 1, %s801_s16  ;;  %s538_s12 = sshll.u32 %s168_s25, 8 }
  0x2a   : > { %p28_p13 = scmp.ge.s32.totalorder %s27_s11, 2  ;;  %s577_s23 = sshll.u32 %s801_s16, 12 }
  0x2b   : > { %s172_s28 = scalar_lea.vmem [#allocation6], %s538_s12  ;;  %s925_s4 = scalar_lea.hbm %s1069_s1, %s577_s23 }
  0x2c   : > { %s182_s29 = sshll.u32 %s172_s28, 4  ;;  %s1094_s11 = smov (%p28_p13, %s27_s11), 0  ;;  %s927_s29 = int_to_ptr.vmem [resolvable:$true] %s182_s29 }
  0x2d   : > { %s55_s24 = ssub.s32 %s801_s16, %s1094_s11  ;;  %s937_s6 = scalar_lea.sflag [#allocation7], %s168_s25 }
  0x2e   : > { %p931_p3 = scmp.eq.s32.totalorder %s55_s24, 0  ;;  %s691_s7 = scalar_lea.hbm %s925_s4, 4096 }
  0x2f   : > { %p692_p6 = scmp.ne.s32.totalorder %s925_s4, %s691_s7  ;;  %p1083_p8 = scmp.ne.s32.totalorder %s1081_s27, 0 }
  0x30   : > { %s696_s10 = scalar_lea.hbm %s1069_s1, 8192  ;;  %p697_p1 = scmp.lt.u32.totalorder %s925_s4, %s1069_s1 }
  0x31   : > { %p693_p11 = pneg %p1083_p8  ;;  %p698_p2 = scmp.lt.u32.totalorder %s696_s10, %s691_s7 }
  0x32   : > { %p700_p4 = scmp.lt.u32.totalorder %s691_s7, %s925_s4 }
  0x33   : > { %p694_p12 = pnand %p693_p11, %p692_p6  ;;  %p699_p5 = por %p698_p2, %p697_p1 }
  0x35   : > { %p695_p0 = pneg %p694_p12  ;;  %p701_p7 = por %p700_p4, %p699_p5 }
  0x37   : > { %p702_p9 = pnand %p701_p7, %p695_p0 }
  0x39   : > { %705 = shalt.err (!%p702_p9)
}
  0x3a   : > { %s706_s25 = scalar_lea.vmem %s927_s29, 4096  ;;  %s808_s28 = smov [#allocation6]  }
  0x3b   : > { %p707_p10 = scmp.ne.s32.totalorder %s927_s29, %s706_s25  ;;  %s711_s26 = sshll.u32 %s808_s28, 4  ;;  %s712_s26 = int_to_ptr.vmem [resolvable:$false] %s711_s26 }
  0x3c   : > { %s713_s30 = scalar_lea.vmem %s712_s26, 8192  ;;  %p714_p12 = scmp.lt.s32.totalorder %s927_s29, %s712_s26 }
  0x3d   : > { %p709_p13 = pnand %p707_p10, %p693_p11  ;;  %p715_p1 = scmp.lt.s32.totalorder %s713_s30, %s706_s25 }
  0x3f   : > { %p710_p6 = pneg %p709_p13  ;;  %p716_p2 = por %p715_p1, %p714_p12 }
  0x41   : > { %p717_p5 = pnand %p716_p2, %p710_p6 }
  0x43   : > { %720 = shalt.err (!%p717_p5)
}
  0x44   : > { %s809_s24 = smov 256   ;;  %s810_s7 = smov 16  }
  0x45   : > { %603 = dma.hbm_to_vmem [thread:$0]  (!%p1083_p8), %s925_s4, 4096, %s927_s29, %s937_s6, %s809_s24, %s809_s24, %s810_s7  }
  0x46   : > { %s970_s8 = scalar_select %p931_p3, %s793_s14, %s60_s19  }
  0x47   : > { %p1084_p11 = scmp.ne.s32.totalorder %s1079_s22, 0 }
  0x48   : > { %p1085_p0 = scmp.ne.s32.totalorder (!%p1084_p11), %s1077_s20, 0 }
  0x49   : > { %194 = sbr.rel (%p1084_p11) target bundleno = 371 (0x173), region = 32 }
  0x50   : > { %772 = dma.done.wait (%p1085_p0), [#allocation4], 128  }
  0x51   : > { %774 = vsyncadd (%p1085_p0), [#allocation4], 4294967168  ;;  %s200_s9 = sand.u32 1, %s789_s13   ;;  %p1086_p8 = scmp.ne.s32.totalorder %s1078_s21, 0 }
  0x52   : > { %s544_s10 = sshll.u32 %s200_s9, 8  ;;  %s201_s12 = scalar_lea.sflag [#allocation7], %s200_s9 }
  0x53   : > { %s979_s27 = scalar_lea.vmem [#allocation6], %s544_s10 }
  0x54   : > { %776 = dma.done.wait (%p1086_p8), %s201_s12, 4096  }
  0x55   : > { %778 = vsyncadd (%p1086_p8), %s201_s12, 4294963200  ;;  %p545_p3 = scmp.ne.s32.totalorder %s797_s15, 0 }
  0x56   : > { %v811_v0 = vmov (!%p545_p3), 0.0  }
  0x57   : > { %237 = sbr.rel (%p545_p3) target bundleno = 94 (0x5e), region = 44  ;;  %238 = vst [vmem:[#allocation2] sm:$0xff] (!%p545_p3), %v811_v0  ;;  %239 = vst [vmem:[#allocation2 + $0x8] sm:$0xff] (!%p545_p3), %v811_v0 }
  0x58   : > { %240 = vst [vmem:[#allocation2 + $0x10] sm:$0xff] (!%p545_p3), %v811_v0  ;;  %241 = vst [vmem:[#allocation2 + $0x18] sm:$0xff] (!%p545_p3), %v811_v0 }
  0x59   : > { %242 = vst [vmem:[#allocation2 + $0x20] sm:$0xff] (!%p545_p3), %v811_v0  ;;  %243 = vst [vmem:[#allocation2 + $0x28] sm:$0xff] (!%p545_p3), %v811_v0 }
  0x5a   : > { %244 = vst [vmem:[#allocation2 + $0x30] sm:$0xff] (!%p545_p3), %v811_v0  ;;  %245 = vst [vmem:[#allocation2 + $0x38] sm:$0xff] (!%p545_p3), %v811_v0 }
  0x5e PF: > { %v246_v1 = vld [vmem:[#allocation2] sm:$0xff]  ;;  %v254_v2 = vld [vmem:[%s979_s27] sm:$0xff]  ;;  %v255_v7 = vld [vmem:[%s979_s27 + $0x8] sm:$0xff]  ;;  %p570_p4 = scmp.ne.s32.totalorder %s797_s15, 1 }
  0x5f   : > { %v546_v3 = vld [vmem:[%s979_s27 + $0x40] sm:$0xff]  ;;  %v262_v4 = vadd.f32 %v254_v2, %v246_v1  ;;  %v547_v8 = vld [vmem:[%s979_s27 + $0x48] sm:$0xff]  ;;  %v256_v13 = vld [vmem:[%s979_s27 + $0x10] sm:$0xff]  ;;  %vm342_vm0 = vcmask (!%p570_p4), 261120  }
  0x60   : > { %v247_v5 = vld [vmem:[#allocation2 + $0x8] sm:$0xff]  ;;  %v248_v12 = vld [vmem:[#allocation2 + $0x10] sm:$0xff]  ;;  %v548_v16 = vld [vmem:[%s979_s27 + $0x50] sm:$0xff] }
  0x61   : > { %v554_v6 = vld [vmem:[%s979_s27 + $0x80] sm:$0xff]  ;;  %v279_v9 = vadd.f32 %v546_v3, %v262_v4  ;;  %v263_v11 = vadd.f32 %v255_v7, %v247_v5  ;;  %v555_v14 = vld [vmem:[%s979_s27 + $0x88] sm:$0xff]  ;;  %v264_v15 = vadd.f32 %v256_v13, %v248_v12  ;;  %v556_v17 = vld [vmem:[%s979_s27 + $0x90] sm:$0xff] }
  0x62   : > { %v562_v10 = vld [vmem:[%s979_s27 + $0xc0] sm:$0xff]  ;;  %v249_v20 = vld [vmem:[#allocation2 + $0x18] sm:$0xff]  ;;  %v257_v21 = vld [vmem:[%s979_s27 + $0x18] sm:$0xff] }
  0x63   : > { %v296_v18 = vadd.f32 %v554_v6, %v279_v9  ;;  %v280_v19 = vadd.f32 %v547_v8, %v263_v11  ;;  %v549_v22 = vld [vmem:[%s979_s27 + $0x58] sm:$0xff]  ;;  %v563_v23 = vld [vmem:[%s979_s27 + $0xc8] sm:$0xff]  ;;  %v281_v24 = vadd.f32 %v548_v16, %v264_v15  ;;  %v564_v25 = vld [vmem:[%s979_s27 + $0xd0] sm:$0xff]  ;;  %v265_v26 = vadd.f32 %v257_v21, %v249_v20 }
  0x64   : > { %v250_v27 = vld [vmem:[#allocation2 + $0x20] sm:$0xff]  ;;  %v258_v31 = vld [vmem:[%s979_s27 + $0x20] sm:$0xff]  ;;  %v259_v38 = vld [vmem:[%s979_s27 + $0x28] sm:$0xff]  ;;  %v812_v16 = vmov (!%p570_p4), 0.0  }
  0x65   : > { %v313_v28 = vadd.f32 %v562_v10, %v296_v18  ;;  %v297_v29 = vadd.f32 %v555_v14, %v280_v19  ;;  %v557_v30 = vld [vmem:[%s979_s27 + $0x98] sm:$0xff]  ;;  %v550_v32 = vld [vmem:[%s979_s27 + $0x60] sm:$0xff]  ;;  %v298_v33 = vadd.f32 %v556_v17, %v281_v24  ;;  %v282_v34 = vadd.f32 %v549_v22, %v265_v26  ;;  %v551_v42 = vld [vmem:[%s979_s27 + $0x68] sm:$0xff]  ;;  %410 = vmatprep.mubr.f32.mxu0 (!%p570_p4), %v812_v16 }
  0x66   : > { %v565_v35 = vld [vmem:[%s979_s27 + $0xd8] sm:$0xff]  ;;  %v266_v36 = vadd.f32 %v258_v31, %v250_v27  ;;  %v251_v37 = vld [vmem:[#allocation2 + $0x28] sm:$0xff]  ;;  %v559_v43 = vld [vmem:[%s979_s27 + $0xa8] sm:$0xff] }
  0x67   : > { %321 = vst [vmem:[#allocation2] sm:$0xff] %v313_v28  ;;  %v314_v39 = vadd.f32 %v563_v23, %v297_v29  ;;  %v558_v40 = vld [vmem:[%s979_s27 + $0xa0] sm:$0xff]  ;;  %v267_v41 = vadd.f32 %v259_v38, %v251_v37  ;;  %v315_v44 = vadd.f32 %v564_v25, %v298_v33  ;;  %v299_v45 = vadd.f32 %v557_v30, %v282_v34  ;;  %v252_v47 = vld [vmem:[#allocation2 + $0x30] sm:$0xff]  ;;  %v260_v48 = vld [vmem:[%s979_s27 + $0x30] sm:$0xff] }
  0x68   : > { %v283_v46 = vadd.f32 %v550_v32, %v266_v36  ;;  %v552_v49 = vld [vmem:[%s979_s27 + $0x70] sm:$0xff]  ;;  %v566_v50 = vld [vmem:[%s979_s27 + $0xe0] sm:$0xff]  ;;  %v567_v52 = vld [vmem:[%s979_s27 + $0xe8] sm:$0xff]  ;;  %v268_v53 = vadd.f32 %v260_v48, %v252_v47  ;;  %v421_v23 = vlaneseq (!%p570_p4) }
  0x69   : > { %322 = vst [vmem:[#allocation2 + $0x8] sm:$0xff] %v314_v39  ;;  %v284_v51 = vadd.f32 %v551_v42, %v267_v41  ;;  %v253_v54 = vld [vmem:[#allocation2 + $0x38] sm:$0xff]  ;;  %323 = vst [vmem:[#allocation2 + $0x10] sm:$0xff] %v315_v44  ;;  %v316_v55 = vadd.f32 %v565_v35, %v299_v45  ;;  %v261_v58 = vld [vmem:[%s979_s27 + $0x38] sm:$0xff] }
  0x6a   : > { %v300_v56 = vadd.f32 %v558_v40, %v283_v46  ;;  %v560_v57 = vld [vmem:[%s979_s27 + $0xb0] sm:$0xff]  ;;  %v553_v59 = vld [vmem:[%s979_s27 + $0x78] sm:$0xff]  ;;  %v285_v61 = vadd.f32 %v552_v49, %v268_v53  ;;  %v269_v62 = vadd.f32 %v261_v58, %v253_v54  ;;  %v422_v24 = vshrl.u32 (!%p570_p4), %v421_v23, 7 }
  0x6b   : > { %v301_v60 = vadd.f32 %v559_v43, %v284_v51  ;;  %324 = vst [vmem:[#allocation2 + $0x18] sm:$0xff] %v316_v55  ;;  %v568_v0 = vld [vmem:[%s979_s27 + $0xf0] sm:$0xff]  ;;  %v561_v1 = vld [vmem:[%s979_s27 + $0xb8] sm:$0xff] }
  0x6c   : > { %v317_v63 = vadd.f32 %v566_v50, %v300_v56  ;;  %v302_v3 = vadd.f32 %v560_v57, %v285_v61  ;;  %v286_v4 = vadd.f32 %v553_v59, %v269_v62  ;;  %v569_v5 = vld [vmem:[%s979_s27 + $0xf8] sm:$0xff]  ;;  %332 = sbr.rel (%p570_p4) target bundleno = 346 (0x15a), region = 48  ;;  %v423_v25 = vsub.s32 (!%p570_p4), 0, %v422_v24 }
  0x6d   : > { %v318_v2 = vadd.f32 %v567_v52, %v301_v60  ;;  %v333_v22 = vld [vmem:[#allocation3] sm:$0xff] (!%p570_p4)  ;;  %v427_v27 = vsub.s32 (!%p570_p4), 1, %v422_v24 }
  0x6e   : > { %325 = vst [vmem:[#allocation2 + $0x20] sm:$0xff] %v317_v63  ;;  %v319_v6 = vadd.f32 %v568_v0, %v302_v3  ;;  %v303_v7 = vadd.f32 %v561_v1, %v286_v4  ;;  %v334_v11 = vld [vmem:[#allocation2] sm:$0xff] (!%p570_p4) }
  0x6f   : > { %326 = vst [vmem:[#allocation2 + $0x28] sm:$0xff] %v318_v2  ;;  %v419_v26 = vld [vmem:[%s1070_s2] sm:$0x3] (!%p570_p4) }
  0x70   : > { %327 = vst [vmem:[#allocation2 + $0x30] sm:$0xff] %v319_v6  ;;  %v320_v8 = vadd.f32 %v569_v5, %v303_v7  ;;  %v335_v9 = vld [vmem:[#allocation2 + $0x8] sm:$0xff] (!%p570_p4)  ;;  %v336_v13 = vld [vmem:[#allocation2 + $0x10] sm:$0xff] (!%p570_p4)  ;;  %v424_v28 = vrot.slane (!%p570_p4), %v419_v26, %v423_v25  ;;  %v428_v30 = vrot.slane (!%p570_p4), %v419_v26, %v427_v27 }
  0x71   : > { %v580_v17 = vpack.c.bf16 (!%p570_p4), %v336_v13, %v334_v11 }
  0x72   : > { %328 = vst [vmem:[#allocation2 + $0x38] sm:$0xff] %v320_v8  ;;  %v337_v10 = vld [vmem:[#allocation2 + $0x18] sm:$0xff] (!%p570_p4) }
  0x73   : > { %v578_v12 = vpack.c.bf16 %v337_v10, %v335_v9 }
  0x75   : > { %v338_v19 = vld [vmem:[#allocation2 + $0x20] sm:$0xff]  ;;  %579 = vmatprep.subr.bf16.mxu0 %v578_v12 }
  0x76   : > { %v339_v14 = vld [vmem:[#allocation2 + $0x28] sm:$0xff]  ;;  %581 = vmatpush1.bf16.msra.mxu0 %v580_v17 }
  0x77   : > { %v340_v20 = vld [vmem:[#allocation2 + $0x30] sm:$0xff] }
  0x78   : > { %v584_v21 = vpack.c.bf16 %v340_v20, %v338_v19 }
  0x79   : > { %v341_v15 = vld [vmem:[#allocation2 + $0x38] sm:$0xff] }
  0x7a   : > { %v582_v18 = vpack.c.bf16 %v341_v15, %v339_v14 }
  0x7c   : > { %583 = vmatprep.subr.bf16.mxu0 %v582_v18 }
  0x7d   : > { %585 = vmatpush1.bf16.msra.mxu0 %v584_v21 }
  0x80   : > { %571 = vmatmul.mubr.msk.f32.vlgmr.msra.gmra.mrb[0].mxu0 %vm342_vm0, %v333_v22 }
 0x153   : > { %v412_v29 = vpop.f32.mrb[0].mxu0 }
 0x154   : > { %v417_v31 = vmul.f32 0.2, %v412_v29  ;;  %v414_v32 = vpop.f32.mrb[1].mxu0 }
 0x155   : > { %v418_v33 = vmul.f32 0.2, %v414_v32 }
 0x156   : > { %v431_v34 = vadd.f32 %v424_v28, %v417_v31 }
 0x157   : > { %v432_v35 = vadd.f32 %v428_v30, %v418_v33 }
 0x158   : > { %433 = vst [vmem:[#allocation8] sm:$0xff] %v431_v34 }
 0x159   : > { %434 = vst [vmem:[#allocation8 + $0x8] sm:$0xff] %v432_v35 }
 0x15a PF: > { %p1024_p7 = scmp.eq.s32.totalorder %s533_s18, 1  ;;  %s813_s21 = smov [#allocation8]  }
 0x15b   : > { %s445_s22 = sshll.u32 %s813_s21, 4  ;;  %s446_s22 = int_to_ptr.vmem [resolvable:$true] %s445_s22 }
 0x15c   : > { %s721_s29 = scalar_lea.vmem %s446_s22, 256  ;;  %p728_p6 = scmp.lt.s32.totalorder %s446_s22, %s446_s22 }
 0x15d   : > { %p722_p9 = scmp.ne.s32.totalorder %s446_s22, %s721_s29  ;;  %p729_p12 = scmp.lt.s32.totalorder %s721_s29, %s721_s29 }
 0x15f   : > { %p723_p10 = pnand %p722_p9, %p1024_p7  ;;  %p730_p1 = por %p729_p12, %p728_p6 }
 0x161   : > { %p724_p13 = pneg %p723_p10 }
 0x163   : > { %p731_p2 = pnand %p730_p1, %p724_p13 }
 0x165   : > { %734 = shalt.err (!%p731_p2)
}
 0x166   : > { %s735_s18 = scalar_lea.hbm %s1071_s3, 256 }
 0x167   : > { %p736_p5 = scmp.ne.s32.totalorder %s1071_s3, %s735_s18  ;;  %p741_p8 = scmp.lt.u32.totalorder %s735_s18, %s1071_s3 }
 0x169   : > { %p737_p11 = pnand %p736_p5, %p1024_p7 }
 0x16b   : > { %p738_p0 = pneg %p737_p11 }
 0x16d   : > { %p743_p3 = pnand %p741_p8, %p738_p0 }
 0x16f   : > { %746 = shalt.err (!%p743_p3)
}
 0x170   : > { %593 = dma.vmem_to_hbm [thread:$0]  (%p1024_p7), %s446_s22, 256, %s1071_s3, [#allocation5]  }
 0x171   : > { %780 = dma.done.wait (%p1024_p7), [#allocation5], 256  }
 0x172   : > { %782 = vsyncadd (%p1024_p7), [#allocation5], 4294967040 }
 0x173 PF: > { %s18_s17 = sadd.s32 1, %s805_s17   ;;  %s1088_s12 = smov %s789_s13 }
 0x174   : > { %p15_p4 = scmp.ge.s32.totalorder %s18_s17, 4   ;;  %s1089_s13 = smov %s793_s14 }
 0x175   : > { %s1090_s14 = smov %s970_s8  ;;  %s1091_s15 = smov %s801_s16 }
 0x176   : > { %s1092_s16 = smov %s1094_s11  ;;  %17 = sbr.rel (!%p15_p4) target bundleno = 6 (0x6), region = 89 }
 0x17d   :  { %458 = vsyncpa [#allocation4], 1 }
 0x17e   :  { %460 = vsyncpa [#allocation4 + $0x1], 1 }
 0x17f   :  { %461 = vsyncpa [#allocation7], 1 }
 0x180   :  { %463 = vsyncpa [#allocation7 + $0x1], 1 }
 0x181   :  { %464 = vsyncpa [#allocation5], 1 }
 0x182   :  { %466 = vsyncpa [#allocation5 + $0x1], 1 }

</bundles_post_ra>
